<compile_context>
chip_gen: v6e
topology: v6e:2x2x1
jax: 0.10.0
libtpu: 0.0.40
codegen_flags: <defaults>
</compile_context>

<pallas_src>
import jax
import jax.numpy as jnp
from jax.experimental import pallas as pl
from jax.experimental.pallas import tpu as pltpu

_LANE = 128
_SUBLANE = 8


def _round_up(x, m):
    return ((x + m - 1) // m) * m


# ----------------------------------------------------------------------------
# Kernel
# ----------------------------------------------------------------------------
def _double_critic_kernel(
    q_ref, lm_ref,
    w1q_ref, b1q_ref, w1v_ref, b1v_ref,
    w2c1_ref, b2c1_ref, w2c2_ref, b2c2_ref,
    w2v1_ref, b2v1_ref, w2v2_ref, b2v2_ref,
    w3_ref, b3_ref,
    out_ref,
):
    f32 = jnp.float32
    dp = lm_ref.shape[-1]            # padded hidden dim (multiple of 128)
    q = q_ref[...]                   # (bB, 2*Dp)  bf16 == [lm | act]
    lm = lm_ref[...]                 # (bB,   Dp)  bf16
    cdt = q.dtype

    # ---- layer 1: two wide matmuls (both Q-heads fused, both V-heads fused)
    hq = jnp.dot(q, w1q_ref[...], preferred_element_type=f32) + b1q_ref[...]
    hq = jnp.maximum(hq, 0.0).astype(cdt)          # (bB, 2*Dp)
    hv = jnp.dot(lm, w1v_ref[...], preferred_element_type=f32) + b1v_ref[...]
    hv = jnp.maximum(hv, 0.0).astype(cdt)          # (bB, 2*Dp)

    # ---- layer 2: per-head (Dp x Dp) matmuls, f32 accumulate
    def _layer2(h, w_ref, b_ref):
        g = jnp.dot(h, w_ref[...], preferred_element_type=f32) + b_ref[...]
        return jnp.maximum(g, 0.0).astype(cdt)

    g_c1 = _layer2(hq[:, :dp], w2c1_ref, b2c1_ref)
    g_c2 = _layer2(hq[:, dp:], w2c2_ref, b2c2_ref)
    g_v1 = _layer2(hv[:, :dp], w2v1_ref, b2v1_ref)
    g_v2 = _layer2(hv[:, dp:], w2v2_ref, b2v2_ref)

    # ---- layer 3: all four heads as one block-diagonal matmul producing a
    # single lane-dense output slab (unmasked stores).
    g = jnp.concatenate([g_c1, g_c2, g_v1, g_v2], axis=1)   # (bB, 4*Dp)
    out_ref[...] = (jnp.dot(g, w3_ref[...], preferred_element_type=f32)
                    + b3_ref[...])


# ----------------------------------------------------------------------------
# One-time weight packing (PyTorch-layout params -> fused/padded bf16 layout)
# ----------------------------------------------------------------------------
def pack_params(params, in_dim, out_dim, weight_dtype=jnp.bfloat16):
    D = in_dim
    Dp = _round_up(D, _LANE)
    out_slab = _round_up(4 * out_dim, _LANE)
    wt = weight_dtype
    f32 = jnp.float32

    def cast(name):
        return params[name].astype(wt)

    # layer 1, Q pair: rows [0:Dp) = lm features, [Dp:2Dp) = action features;
    # cols [0:Dp) = critic1 hidden, [Dp:2Dp) = critic2 hidden.
    w1q = jnp.zeros((2 * Dp, 2 * Dp), wt)
    w1q = w1q.at[0:D, 0:D].set(cast("c1_w1")[:D])
    w1q = w1q.at[Dp:Dp + D, 0:D].set(cast("c1_w1")[D:])
    w1q = w1q.at[0:D, Dp:Dp + D].set(cast("c2_w1")[:D])
    w1q = w1q.at[Dp:Dp + D, Dp:Dp + D].set(cast("c2_w1")[D:])
    b1q = jnp.zeros((1, 2 * Dp), f32)
    b1q = b1q.at[0, 0:D].set(params["c1_b1"])
    b1q = b1q.at[0, Dp:Dp + D].set(params["c2_b1"])

    # layer 1, V pair.
    w1v = jnp.zeros((Dp, 2 * Dp), wt)
    w1v = w1v.at[0:D, 0:D].set(cast("v1_w1"))
    w1v = w1v.at[0:D, Dp:Dp + D].set(cast("v2_w1"))
    b1v = jnp.zeros((1, 2 * Dp), f32)
    b1v = b1v.at[0, 0:D].set(params["v1_b1"])
    b1v = b1v.at[0, Dp:Dp + D].set(params["v2_b1"])

    def pad_w2(name):
        return jnp.zeros((Dp, Dp), wt).at[0:D, 0:D].set(cast(name))

    def pad_b2(name):
        return jnp.zeros((1, Dp), f32).at[0, 0:D].set(params[name])

    # layer 3: block-diagonal (4*Dp, out_slab); head i writes cols
    # [i*out_dim, (i+1)*out_dim).
    w3 = jnp.zeros((4 * Dp, out_slab), wt)
    b3 = jnp.zeros((1, out_slab), f32)
    for i, head in enumerate(("c1", "c2", "v1", "v2")):
        w3 = w3.at[i * Dp:i * Dp + D,
                   i * out_dim:(i + 1) * out_dim].set(cast(f"{head}_w3"))
        b3 = b3.at[0, i * out_dim:(i + 1) * out_dim].set(params[f"{head}_b3"])

    return {
        "D": D, "Dp": Dp, "out_dim": out_dim, "out_slab": out_slab,
        "w1q": w1q, "b1q": b1q, "w1v": w1v, "b1v": b1v,
        "w2c1": pad_w2("c1_w2"), "b2c1": pad_b2("c1_b2"),
        "w2c2": pad_w2("c2_w2"), "b2c2": pad_b2("c2_b2"),
        "w2v1": pad_w2("v1_w2"), "b2v1": pad_b2("v1_b2"),
        "w2v2": pad_w2("v2_w2"), "b2v2": pad_b2("v2_b2"),
        "w3": w3, "b3": b3,
    }


# ----------------------------------------------------------------------------
# Wrapper
# ----------------------------------------------------------------------------
def double_critic_forward(lm_states, action_states, packed):
    """Returns (q1, q2, v1, v2), matching PyTorch DoubleCritic.forward order."""
    B, D = lm_states.shape
    Dp = packed["Dp"]
    out_dim = packed["out_dim"]
    out_slab = packed["out_slab"]
    assert packed["D"] == D

    # Batch tiling: rows padded to the sublane/block multiple; weights stay
    # VMEM-resident across the grid (constant index_map).
    block_b = min(256, _round_up(B, _SUBLANE))
    Bp = _round_up(B, block_b)

    def pad_act(x):
        buf = jnp.zeros((Bp, Dp), jnp.bfloat16)
        return buf.at[:B, :D].set(x.astype(jnp.bfloat16))

    lm_p = pad_act(lm_states)
    act_p = pad_act(action_states)
    q_p = jnp.concatenate([lm_p, act_p], axis=1)         # (Bp, 2*Dp)

    weight_names = ("w1q", "b1q", "w1v", "b1v",
                    "w2c1", "b2c1", "w2c2", "b2c2",
                    "w2v1", "b2v1", "w2v2", "b2v2",
                    "w3", "b3")
    weights = tuple(packed[n] for n in weight_names)

    def _w_spec(w):
        return pl.BlockSpec(w.shape, lambda i: (0,) * w.ndim)

    in_specs = ([pl.BlockSpec((block_b, 2 * Dp), lambda i: (i, 0)),
                 pl.BlockSpec((block_b, Dp), lambda i: (i, 0))]
                + [_w_spec(w) for w in weights])
    out_spec = pl.BlockSpec((block_b, out_slab), lambda i: (i, 0))

    # Explicit VMEM budget (scoped defaults: 16 MiB v5e / 32 MiB v6e, v7x).
    def _nbytes(a):
        return a.size * a.dtype.itemsize

    weight_bytes = sum(_nbytes(w) for w in weights)
    act_bytes = block_b * 3 * Dp * 2            # q + lm (bf16)
    out_bytes = block_b * out_slab * 4          # f32 slab
    vmem_need = 2 * (act_bytes + out_bytes) + weight_bytes + (4 << 20)
    vmem_limit = int(min(64 << 20, max(32 << 20, vmem_need)))

    slab = pl.pallas_call(
        _double_critic_kernel,
        out_shape=jax.ShapeDtypeStruct((Bp, out_slab), jnp.float32),
        grid=(Bp // block_b,),
        in_specs=in_specs,
        out_specs=out_spec,
        compiler_params=pltpu.CompilerParams(
            dimension_semantics=("parallel",),
            vmem_limit_bytes=vmem_limit),
    )(q_p, lm_p, *weights)

    q1 = slab[:B, 0 * out_dim:1 * out_dim]
    q2 = slab[:B, 1 * out_dim:2 * out_dim]
    v1 = slab[:B, 2 * out_dim:3 * out_dim]
    v2 = slab[:B, 3 * out_dim:4 * out_dim]
    return q1, q2, v1, v2


# ----------------------------------------------------------------------------
# Synthetic parameters (nn.Linear init, stored transposed to (in, out))
# ----------------------------------------------------------------------------
def init_params(key, in_dim, out_dim):
    names_shapes = []
    for head in ("c1", "c2"):
        names_shapes += [
            (f"{head}_w1", (2 * in_dim, in_dim)), (f"{head}_b1", (in_dim,)),
            (f"{head}_w2", (in_dim, in_dim)),     (f"{head}_b2", (in_dim,)),
            (f"{head}_w3", (in_dim, out_dim)),    (f"{head}_b3", (out_dim,)),
        ]
    for head in ("v1", "v2"):
        names_shapes += [
            (f"{head}_w1", (in_dim, in_dim)),  (f"{head}_b1", (in_dim,)),
            (f"{head}_w2", (in_dim, in_dim)),  (f"{head}_b2", (in_dim,)),
            (f"{head}_w3", (in_dim, out_dim)), (f"{head}_b3", (out_dim,)),
        ]
    params = {}
    keys = jax.random.split(key, len(names_shapes))
    for (name, shape), k in zip(names_shapes, keys):
        fan_in = shape[0]
        scale = 1.0 / jnp.sqrt(jnp.float32(fan_in))
        params[name] = jax.random.uniform(
            k, shape, dtype=jnp.float32, minval=-scale, maxval=scale)
    return params


# ----------------------------------------------------------------------------
# Pure-JAX reference (mirrors the kernel's bf16-weight / f32-accum precision)
# ----------------------------------------------------------------------------
def _reference(lm, act, p):
    bf = jnp.bfloat16

    def lin(x, w, b):
        return jnp.dot(x.astype(bf), w.astype(bf),
                       preferred_element_type=jnp.float32) + b

    def mlp(x, w1, b1, w2, b2, w3, b3):
        h = jnp.maximum(lin(x, w1, b1), 0.0)
        h = jnp.maximum(lin(h, w2, b2), 0.0)
        return lin(h, w3, b3)

    q = jnp.concatenate([lm, act], axis=1)
    return (
        mlp(q, p["c1_w1"], p["c1_b1"], p["c1_w2"], p["c1_b2"], p["c1_w3"], p["c1_b3"]),
        mlp(q, p["c2_w1"], p["c2_b1"], p["c2_w2"], p["c2_b2"], p["c2_w3"], p["c2_b3"]),
        mlp(lm, p["v1_w1"], p["v1_b1"], p["v1_w2"], p["v1_b2"], p["v1_w3"], p["v1_b3"]),
        mlp(lm, p["v2_w1"], p["v2_b1"], p["v2_w2"], p["v2_b2"], p["v2_w3"], p["v2_b3"]),
    )


if __name__ == "__main__":
    B, IN_DIM, OUT_DIM = 8, 32, 4

    key = jax.random.PRNGKey(0)
    k_lm, k_act, k_params = jax.random.split(key, 3)

    # Stand-ins for base_lm(...).pooler_output of observation / action.
    lm_states = jax.random.normal(k_lm, (B, IN_DIM), dtype=jnp.float32)
    action_states = jax.random.normal(k_act, (B, IN_DIM), dtype=jnp.float32)
    params = init_params(k_params, IN_DIM, OUT_DIM)

    packed = pack_params(params, IN_DIM, OUT_DIM)          # one-time packing
    q1, q2, v1, v2 = double_critic_forward(lm_states, action_states, packed)
    jax.block_until_ready((q1, q2, v1, v2))

    rq1, rq2, rv1, rv2 = _reference(lm_states, action_states, params)
    for got, want in ((q1, rq1), (q2, rq2), (v1, rv1), (v2, rv2)):
        assert got.shape == (B, OUT_DIM)
        assert jnp.allclose(got, want, atol=1e-3, rtol=1e-3)

    print("KERNEL_OK")
</pallas_src>

<mosaic_0001>
module attributes {stable_mosaic.version = 11 : i64} {
  func.func @_double_critic_kernel(%arg0: i32, %arg1: memref<8x256xbf16, #tpu.memory_space<vmem>>, %arg2: memref<8x128xbf16, #tpu.memory_space<vmem>>, %arg3: memref<256x256xbf16, #tpu.memory_space<vmem>>, %arg4: memref<1x256xf32, #tpu.memory_space<vmem>>, %arg5: memref<128x256xbf16, #tpu.memory_space<vmem>>, %arg6: memref<1x256xf32, #tpu.memory_space<vmem>>, %arg7: memref<128x128xbf16, #tpu.memory_space<vmem>>, %arg8: memref<1x128xf32, #tpu.memory_space<vmem>>, %arg9: memref<128x128xbf16, #tpu.memory_space<vmem>>, %arg10: memref<1x128xf32, #tpu.memory_space<vmem>>, %arg11: memref<128x128xbf16, #tpu.memory_space<vmem>>, %arg12: memref<1x128xf32, #tpu.memory_space<vmem>>, %arg13: memref<128x128xbf16, #tpu.memory_space<vmem>>, %arg14: memref<1x128xf32, #tpu.memory_space<vmem>>, %arg15: memref<512x128xbf16, #tpu.memory_space<vmem>>, %arg16: memref<1x128xf32, #tpu.memory_space<vmem>>, %arg17: memref<8x128xf32, #tpu.memory_space<vmem>>) attributes {dimension_semantics = [#tpu.dimension_semantics<parallel>], iteration_bounds = array<i64: 1>, scalar_prefetch = 0 : i64, scratch_operands = 0 : i64, tpu.core_type = #tpu.core_type<tc>, window_params = [{transform_indices = @transform_0, window_bounds = array<i64: 8, 256>}, {transform_indices = @transform_1, window_bounds = array<i64: 8, 128>}, {pipeline_mode = #tpu.pipeline_mode<synchronous>, transform_indices = @transform_2, window_bounds = array<i64: 256, 256>}, {pipeline_mode = #tpu.pipeline_mode<synchronous>, transform_indices = @transform_3, window_bounds = array<i64: 1, 256>}, {pipeline_mode = #tpu.pipeline_mode<synchronous>, transform_indices = @transform_4, window_bounds = array<i64: 128, 256>}, {pipeline_mode = #tpu.pipeline_mode<synchronous>, transform_indices = @transform_5, window_bounds = array<i64: 1, 256>}, {pipeline_mode = #tpu.pipeline_mode<synchronous>, transform_indices = @transform_6, window_bounds = array<i64: 128, 128>}, {pipeline_mode = #tpu.pipeline_mode<synchronous>, transform_indices = @transform_7, window_bounds = array<i64: 1, 128>}, {pipeline_mode = #tpu.pipeline_mode<synchronous>, transform_indices = @transform_8, window_bounds = array<i64: 128, 128>}, {pipeline_mode = #tpu.pipeline_mode<synchronous>, transform_indices = @transform_9, window_bounds = array<i64: 1, 128>}, {pipeline_mode = #tpu.pipeline_mode<synchronous>, transform_indices = @transform_10, window_bounds = array<i64: 128, 128>}, {pipeline_mode = #tpu.pipeline_mode<synchronous>, transform_indices = @transform_11, window_bounds = array<i64: 1, 128>}, {pipeline_mode = #tpu.pipeline_mode<synchronous>, transform_indices = @transform_12, window_bounds = array<i64: 128, 128>}, {pipeline_mode = #tpu.pipeline_mode<synchronous>, transform_indices = @transform_13, window_bounds = array<i64: 1, 128>}, {pipeline_mode = #tpu.pipeline_mode<synchronous>, transform_indices = @transform_14, window_bounds = array<i64: 512, 128>}, {pipeline_mode = #tpu.pipeline_mode<synchronous>, transform_indices = @transform_15, window_bounds = array<i64: 1, 128>}, {transform_indices = @transform_16, window_bounds = array<i64: 8, 128>}]} {
    %c0 = arith.constant 0 : index
    %c0_0 = arith.constant 0 : index
    %0 = vector.load %arg1[%c0, %c0_0] : memref<8x256xbf16, #tpu.memory_space<vmem>>, vector<8x256xbf16>
    %c0_1 = arith.constant 0 : index
    %c0_2 = arith.constant 0 : index
    %1 = vector.load %arg2[%c0_1, %c0_2] : memref<8x128xbf16, #tpu.memory_space<vmem>>, vector<8x128xbf16>
    %c0_3 = arith.constant 0 : index
    %c0_4 = arith.constant 0 : index
    %2 = vector.load %arg3[%c0_3, %c0_4] : memref<256x256xbf16, #tpu.memory_space<vmem>>, vector<256x256xbf16>
    %cst = arith.constant dense<0.000000e+00> : vector<8x256xf32>
    %3 = tpu.matmul %0, %2, %cst {dimension_numbers = #tpu.dot_dimension_numbers<[1], [0], [0], [1], [0, 0, 1, 1], [], []>} : vector<8x256xbf16>, vector<256x256xbf16>, vector<8x256xf32> -> vector<8x256xf32>
    %c0_5 = arith.constant 0 : index
    %c0_6 = arith.constant 0 : index
    %4 = vector.load %arg4[%c0_5, %c0_6] : memref<1x256xf32, #tpu.memory_space<vmem>>, vector<1x256xf32>
    %5 = vector.broadcast %4 : vector<1x256xf32> to vector<8x256xf32>
    %6 = arith.addf %3, %5 : vector<8x256xf32>
    %cst_7 = arith.constant 0.000000e+00 : f32
    %7 = vector.broadcast %cst_7 : f32 to vector<8x256xf32>
    %8 = arith.maximumf %6, %7 : vector<8x256xf32>
    %9 = arith.truncf %8 : vector<8x256xf32> to vector<8x256xbf16>
    %c0_8 = arith.constant 0 : index
    %c0_9 = arith.constant 0 : index
    %10 = vector.load %arg5[%c0_8, %c0_9] : memref<128x256xbf16, #tpu.memory_space<vmem>>, vector<128x256xbf16>
    %cst_10 = arith.constant dense<0.000000e+00> : vector<8x256xf32>
    %11 = tpu.matmul %1, %10, %cst_10 {dimension_numbers = #tpu.dot_dimension_numbers<[1], [0], [0], [1], [0, 0, 1, 1], [], []>} : vector<8x128xbf16>, vector<128x256xbf16>, vector<8x256xf32> -> vector<8x256xf32>
    %c0_11 = arith.constant 0 : index
    %c0_12 = arith.constant 0 : index
    %12 = vector.load %arg6[%c0_11, %c0_12] : memref<1x256xf32, #tpu.memory_space<vmem>>, vector<1x256xf32>
    %13 = vector.broadcast %12 : vector<1x256xf32> to vector<8x256xf32>
    %14 = arith.addf %11, %13 : vector<8x256xf32>
    %cst_13 = arith.constant 0.000000e+00 : f32
    %15 = vector.broadcast %cst_13 : f32 to vector<8x256xf32>
    %16 = arith.maximumf %14, %15 : vector<8x256xf32>
    %17 = arith.truncf %16 : vector<8x256xf32> to vector<8x256xbf16>
    %18 = vector.extract_strided_slice %9 {offsets = [0, 0], sizes = [8, 128], strides = [1, 1]} : vector<8x256xbf16> to vector<8x128xbf16>
    %c0_14 = arith.constant 0 : index
    %c0_15 = arith.constant 0 : index
    %19 = vector.load %arg7[%c0_14, %c0_15] : memref<128x128xbf16, #tpu.memory_space<vmem>>, vector<128x128xbf16>
    %cst_16 = arith.constant dense<0.000000e+00> : vector<8x128xf32>
    %20 = tpu.matmul %18, %19, %cst_16 {dimension_numbers = #tpu.dot_dimension_numbers<[1], [0], [0], [1], [0, 0, 1, 1], [], []>} : vector<8x128xbf16>, vector<128x128xbf16>, vector<8x128xf32> -> vector<8x128xf32>
    %c0_17 = arith.constant 0 : index
    %c0_18 = arith.constant 0 : index
    %21 = vector.load %arg8[%c0_17, %c0_18] : memref<1x128xf32, #tpu.memory_space<vmem>>, vector<1x128xf32>
    %22 = vector.broadcast %21 : vector<1x128xf32> to vector<8x128xf32>
    %23 = arith.addf %20, %22 : vector<8x128xf32>
    %cst_19 = arith.constant 0.000000e+00 : f32
    %24 = vector.broadcast %cst_19 : f32 to vector<8x128xf32>
    %25 = arith.maximumf %23, %24 : vector<8x128xf32>
    %26 = arith.truncf %25 : vector<8x128xf32> to vector<8x128xbf16>
    %27 = vector.extract_strided_slice %9 {offsets = [0, 128], sizes = [8, 128], strides = [1, 1]} : vector<8x256xbf16> to vector<8x128xbf16>
    %c0_20 = arith.constant 0 : index
    %c0_21 = arith.constant 0 : index
    %28 = vector.load %arg9[%c0_20, %c0_21] : memref<128x128xbf16, #tpu.memory_space<vmem>>, vector<128x128xbf16>
    %cst_22 = arith.constant dense<0.000000e+00> : vector<8x128xf32>
    %29 = tpu.matmul %27, %28, %cst_22 {dimension_numbers = #tpu.dot_dimension_numbers<[1], [0], [0], [1], [0, 0, 1, 1], [], []>} : vector<8x128xbf16>, vector<128x128xbf16>, vector<8x128xf32> -> vector<8x128xf32>
    %c0_23 = arith.constant 0 : index
    %c0_24 = arith.constant 0 : index
    %30 = vector.load %arg10[%c0_23, %c0_24] : memref<1x128xf32, #tpu.memory_space<vmem>>, vector<1x128xf32>
    %31 = vector.broadcast %30 : vector<1x128xf32> to vector<8x128xf32>
    %32 = arith.addf %29, %31 : vector<8x128xf32>
    %cst_25 = arith.constant 0.000000e+00 : f32
    %33 = vector.broadcast %cst_25 : f32 to vector<8x128xf32>
    %34 = arith.maximumf %32, %33 : vector<8x128xf32>
    %35 = arith.truncf %34 : vector<8x128xf32> to vector<8x128xbf16>
    %36 = vector.extract_strided_slice %17 {offsets = [0, 0], sizes = [8, 128], strides = [1, 1]} : vector<8x256xbf16> to vector<8x128xbf16>
    %c0_26 = arith.constant 0 : index
    %c0_27 = arith.constant 0 : index
    %37 = vector.load %arg11[%c0_26, %c0_27] : memref<128x128xbf16, #tpu.memory_space<vmem>>, vector<128x128xbf16>
    %cst_28 = arith.constant dense<0.000000e+00> : vector<8x128xf32>
    %38 = tpu.matmul %36, %37, %cst_28 {dimension_numbers = #tpu.dot_dimension_numbers<[1], [0], [0], [1], [0, 0, 1, 1], [], []>} : vector<8x128xbf16>, vector<128x128xbf16>, vector<8x128xf32> -> vector<8x128xf32>
    %c0_29 = arith.constant 0 : index
    %c0_30 = arith.constant 0 : index
    %39 = vector.load %arg12[%c0_29, %c0_30] : memref<1x128xf32, #tpu.memory_space<vmem>>, vector<1x128xf32>
    %40 = vector.broadcast %39 : vector<1x128xf32> to vector<8x128xf32>
    %41 = arith.addf %38, %40 : vector<8x128xf32>
    %cst_31 = arith.constant 0.000000e+00 : f32
    %42 = vector.broadcast %cst_31 : f32 to vector<8x128xf32>
    %43 = arith.maximumf %41, %42 : vector<8x128xf32>
    %44 = arith.truncf %43 : vector<8x128xf32> to vector<8x128xbf16>
    %45 = vector.extract_strided_slice %17 {offsets = [0, 128], sizes = [8, 128], strides = [1, 1]} : vector<8x256xbf16> to vector<8x128xbf16>
    %c0_32 = arith.constant 0 : index
    %c0_33 = arith.constant 0 : index
    %46 = vector.load %arg13[%c0_32, %c0_33] : memref<128x128xbf16, #tpu.memory_space<vmem>>, vector<128x128xbf16>
    %cst_34 = arith.constant dense<0.000000e+00> : vector<8x128xf32>
    %47 = tpu.matmul %45, %46, %cst_34 {dimension_numbers = #tpu.dot_dimension_numbers<[1], [0], [0], [1], [0, 0, 1, 1], [], []>} : vector<8x128xbf16>, vector<128x128xbf16>, vector<8x128xf32> -> vector<8x128xf32>
    %c0_35 = arith.constant 0 : index
    %c0_36 = arith.constant 0 : index
    %48 = vector.load %arg14[%c0_35, %c0_36] : memref<1x128xf32, #tpu.memory_space<vmem>>, vector<1x128xf32>
    %49 = vector.broadcast %48 : vector<1x128xf32> to vector<8x128xf32>
    %50 = arith.addf %47, %49 : vector<8x128xf32>
    %cst_37 = arith.constant 0.000000e+00 : f32
    %51 = vector.broadcast %cst_37 : f32 to vector<8x128xf32>
    %52 = arith.maximumf %50, %51 : vector<8x128xf32>
    %53 = arith.truncf %52 : vector<8x128xf32> to vector<8x128xbf16>
    %54 = tpu.concatenate %26, %35, %44, %53 in 1 : vector<8x128xbf16>, vector<8x128xbf16>, vector<8x128xbf16>, vector<8x128xbf16> -> vector<8x512xbf16>
    %c0_38 = arith.constant 0 : index
    %c0_39 = arith.constant 0 : index
    %55 = vector.load %arg15[%c0_38, %c0_39] : memref<512x128xbf16, #tpu.memory_space<vmem>>, vector<512x128xbf16>
    %cst_40 = arith.constant dense<0.000000e+00> : vector<8x128xf32>
    %56 = tpu.matmul %54, %55, %cst_40 {dimension_numbers = #tpu.dot_dimension_numbers<[1], [0], [0], [1], [0, 0, 1, 1], [], []>} : vector<8x512xbf16>, vector<512x128xbf16>, vector<8x128xf32> -> vector<8x128xf32>
    %c0_41 = arith.constant 0 : index
    %c0_42 = arith.constant 0 : index
    %57 = vector.load %arg16[%c0_41, %c0_42] : memref<1x128xf32, #tpu.memory_space<vmem>>, vector<1x128xf32>
    %58 = vector.broadcast %57 : vector<1x128xf32> to vector<8x128xf32>
    %59 = arith.addf %56, %58 : vector<8x128xf32>
    %c0_43 = arith.constant 0 : index
    %c0_44 = arith.constant 0 : index
    %60 = vector.load %arg17[%c0_43, %c0_44] : memref<8x128xf32, #tpu.memory_space<vmem>>, vector<8x128xf32>
    tpu.vector_store %arg17[%c0_43, %c0_44], %59 {strides = array<i32>} : memref<8x128xf32, #tpu.memory_space<vmem>>, vector<8x128xf32>,
    return
  }
  func.func @transform_0(%arg0: i32) -> (i32, i32) {
    %c0_i32 = arith.constant 0 : i32
    %c0_i32_0 = arith.constant 0 : i32
    return %arg0, %c0_i32 : i32, i32
  }
  func.func @transform_1(%arg0: i32) -> (i32, i32) {
    %c0_i32 = arith.constant 0 : i32
    %c0_i32_0 = arith.constant 0 : i32
    return %arg0, %c0_i32 : i32, i32
  }
  func.func @transform_2(%arg0: i32) -> (i32, i32) {
    %c0_i32 = arith.constant 0 : i32
    %c0_i32_0 = arith.constant 0 : i32
    %c0_i32_1 = arith.constant 0 : i32
    return %c0_i32, %c0_i32_0 : i32, i32
  }
  func.func @transform_3(%arg0: i32) -> (i32, i32) {
    %c0_i32 = arith.constant 0 : i32
    %c0_i32_0 = arith.constant 0 : i32
    %c0_i32_1 = arith.constant 0 : i32
    return %c0_i32, %c0_i32_0 : i32, i32
  }
  func.func @transform_4(%arg0: i32) -> (i32, i32) {
    %c0_i32 = arith.constant 0 : i32
    %c0_i32_0 = arith.constant 0 : i32
    %c0_i32_1 = arith.constant 0 : i32
    return %c0_i32, %c0_i32_0 : i32, i32
  }
  func.func @transform_5(%arg0: i32) -> (i32, i32) {
    %c0_i32 = arith.constant 0 : i32
    %c0_i32_0 = arith.constant 0 : i32
    %c0_i32_1 = arith.constant 0 : i32
    return %c0_i32, %c0_i32_0 : i32, i32
  }
  func.func @transform_6(%arg0: i32) -> (i32, i32) {
    %c0_i32 = arith.constant 0 : i32
    %c0_i32_0 = arith.constant 0 : i32
    %c0_i32_1 = arith.constant 0 : i32
    return %c0_i32, %c0_i32_0 : i32, i32
  }
  func.func @transform_7(%arg0: i32) -> (i32, i32) {
    %c0_i32 = arith.constant 0 : i32
    %c0_i32_0 = arith.constant 0 : i32
    %c0_i32_1 = arith.constant 0 : i32
    return %c0_i32, %c0_i32_0 : i32, i32
  }
  func.func @transform_8(%arg0: i32) -> (i32, i32) {
    %c0_i32 = arith.constant 0 : i32
    %c0_i32_0 = arith.constant 0 : i32
    %c0_i32_1 = arith.constant 0 : i32
    return %c0_i32, %c0_i32_0 : i32, i32
  }
  func.func @transform_9(%arg0: i32) -> (i32, i32) {
    %c0_i32 = arith.constant 0 : i32
    %c0_i32_0 = arith.constant 0 : i32
    %c0_i32_1 = arith.constant 0 : i32
    return %c0_i32, %c0_i32_0 : i32, i32
  }
  func.func @transform_10(%arg0: i32) -> (i32, i32) {
    %c0_i32 = arith.constant 0 : i32
    %c0_i32_0 = arith.constant 0 : i32
    %c0_i32_1 = arith.constant 0 : i32
    return %c0_i32, %c0_i32_0 : i32, i32
  }
  func.func @transform_11(%arg0: i32) -> (i32, i32) {
    %c0_i32 = arith.constant 0 : i32
    %c0_i32_0 = arith.constant 0 : i32
    %c0_i32_1 = arith.constant 0 : i32
    return %c0_i32, %c0_i32_0 : i32, i32
  }
  func.func @transform_12(%arg0: i32) -> (i32, i32) {
    %c0_i32 = arith.constant 0 : i32
    %c0_i32_0 = arith.constant 0 : i32
    %c0_i32_1 = arith.constant 0 : i32
    return %c0_i32, %c0_i32_0 : i32, i32
  }
  func.func @transform_13(%arg0: i32) -> (i32, i32) {
    %c0_i32 = arith.constant 0 : i32
    %c0_i32_0 = arith.constant 0 : i32
    %c0_i32_1 = arith.constant 0 : i32
    return %c0_i32, %c0_i32_0 : i32, i32
  }
  func.func @transform_14(%arg0: i32) -> (i32, i32) {
    %c0_i32 = arith.constant 0 : i32
    %c0_i32_0 = arith.constant 0 : i32
    %c0_i32_1 = arith.constant 0 : i32
    return %c0_i32, %c0_i32_0 : i32, i32
  }
  func.func @transform_15(%arg0: i32) -> (i32, i32) {
    %c0_i32 = arith.constant 0 : i32
    %c0_i32_0 = arith.constant 0 : i32
    %c0_i32_1 = arith.constant 0 : i32
    return %c0_i32, %c0_i32_0 : i32, i32
  }
  func.func @transform_16(%arg0: i32) -> (i32, i32) {
    %c0_i32 = arith.constant 0 : i32
    %c0_i32_0 = arith.constant 0 : i32
    return %arg0, %c0_i32 : i32, i32
  }
}

</mosaic_0001>

<bundles_post_ra>
// kernel: tpu_custom_call.1
= control target key start
LH: loop header
LB: loop body
LE: loop exit
PB: predicated region body
PF: predicated region fallthrough
CT: control target
= control target key end

     0   :  { %s2268_s0 = inlined_call_operand.hbm [shape: bf16[8,256], index: 0, kind: input, shape index: {}]   ;;  %s2269_s1 = inlined_call_operand.hbm [shape: bf16[8,128], index: 1, kind: input, shape index: {}]   ;;  %s2270_s2 = inlined_call_operand.hbm [shape: bf16[256,256], index: 2, kind: input, shape index: {}]   ;;  %s2271_s3 = inlined_call_operand.vmem [shape: f32[1,256], index: 3, kind: input, shape index: {}]   ;;  %s2272_s4 = inlined_call_operand.hbm [shape: bf16[128,256], index: 4, kind: input, shape index: {}]   ;;  %s2273_s5 = inlined_call_operand.vmem [shape: f32[1,256], index: 5, kind: input, shape index: {}]   ;;  %s2274_s6 = inlined_call_operand.hbm [shape: bf16[128,128], index: 6, kind: input, shape index: {}]   ;;  %s2275_s7 = inlined_call_operand.vmem [shape: f32[1,128], index: 7, kind: input, shape index: {}]   ;;  %s2276_s8 = inlined_call_operand.hbm [shape: bf16[128,128], index: 8, kind: input, shape index: {}]   ;;  %s2277_s9 = inlined_call_operand.vmem [shape: f32[1,128], index: 9, kind: input, shape index: {}]   ;;  %s2278_s10 = inlined_call_operand.hbm [shape: bf16[128,128], index: 10, kind: input, shape index: {}]   ;;  %s2279_s11 = inlined_call_operand.vmem [shape: f32[1,128], index: 11, kind: input, shape index: {}]   ;;  %s2280_s12 = inlined_call_operand.hbm [shape: bf16[128,128], index: 12, kind: input, shape index: {}]   ;;  %s2281_s13 = inlined_call_operand.vmem [shape: f32[1,128], index: 13, kind: input, shape index: {}]   ;;  %s2282_s14 = inlined_call_operand.hbm [shape: bf16[512,128], index: 14, kind: input, shape index: {}]   ;;  %s2283_s15 = inlined_call_operand.vmem [shape: f32[1,128], index: 15, kind: input, shape index: {}]   ;;  %s2284_s16 = inlined_call_operand.hbm [shape: f32[8,128], index: 16, kind: output, shape index: {}]  }
   0x1   :  { %2285 = sst [smem:[#allocation24_spill]] %s2268_s0 }
   0x2   :  { %21 = vsyncpa [#allocation3], 0 }
   0x3   :  { %22 = vsyncpa [#allocation6], 0 }
   0x4   :  { %23 = vsyncpa [#allocation9], 0 }
   0x5   :  { %24 = vsyncpa [#allocation12], 0 }
   0x6   :  { %25 = vsyncpa [#allocation15], 0 }
   0x7   :  { %26 = vsyncpa [#allocation4], 0  ;;  %s2045_s21 = smov [#allocation5]  }
   0x8   :  { %s43_s22 = sshll.u32 %s2045_s21, 4  ;;  %s44_s22 = int_to_ptr.vmem [resolvable:$true] %s43_s22 }
   0x9   :  { %s1841_s23 = scalar_lea.vmem %s44_s22, 64  ;;  %p1846_p1 = scmp.lt.s32.totalorder %s44_s22, %s44_s22 }
   0xa   :  { %p1842_p0 = scmp.ne.s32.totalorder %s44_s22, %s1841_s23  ;;  %p1847_p2 = scmp.lt.s32.totalorder %s1841_s23, %s1841_s23 }
   0xc   :  { %p1848_p3 = por %p1847_p2, %p1846_p1 }
   0xe   :  { %p1849_p4 = pnand %p1848_p3, %p1842_p0 }
  0x10   :  { %1852 = shalt.err (!%p1849_p4)
}
  0x11   :  { %46 = dma.hbm_to_vmem [thread:$0]  %s2269_s1, 64, %s44_s22, [#allocation6]  }
  0x12   :  { %s2046_s26 = smov [#allocation8]  }
  0x13   :  { %s66_s27 = sshll.u32 %s2046_s26, 4  ;;  %s67_s27 = int_to_ptr.vmem [resolvable:$true] %s66_s27 }
  0x14   :  { %s1861_s28 = scalar_lea.vmem %s67_s27, 2048  ;;  %p1866_p6 = scmp.lt.s32.totalorder %s67_s27, %s67_s27 }
  0x15   :  { %p1862_p5 = scmp.ne.s32.totalorder %s67_s27, %s1861_s28  ;;  %p1867_p7 = scmp.lt.s32.totalorder %s1861_s28, %s1861_s28 }
  0x17   :  { %p1868_p8 = por %p1867_p7, %p1866_p6 }
  0x19   :  { %p1869_p9 = pnand %p1868_p8, %p1862_p5 }
  0x1b   :  { %1872 = shalt.err (!%p1869_p9)
}
  0x1c   :  { %s2047_s29 = smov 128   ;;  %s2048_s30 = smov 8  }
  0x1d   :  { %72 = dma.hbm_to_vmem [thread:$0]  %s2272_s4, 2048, %s67_s27, [#allocation9], %s2047_s29, %s2047_s29, %s2048_s30  }
  0x1e   :  { %s2049_s1 = smov [#allocation11]   ;;  %s2050_s19 = smov [#allocation14]  }
  0x1f   :  { %s94_s18 = sshll.u32 %s2049_s1, 4  ;;  %s122_s20 = sshll.u32 %s2050_s19, 4  ;;  %s95_s18 = int_to_ptr.vmem [resolvable:$true] %s94_s18  ;;  %s123_s20 = int_to_ptr.vmem [resolvable:$true] %s122_s20 }
  0x20   :  { %s1881_s21 = scalar_lea.vmem %s95_s18, 1024  ;;  %p1886_p11 = scmp.lt.s32.totalorder %s95_s18, %s95_s18 }
  0x21   :  { %p1882_p10 = scmp.ne.s32.totalorder %s95_s18, %s1881_s21  ;;  %p1887_p12 = scmp.lt.s32.totalorder %s1881_s21, %s1881_s21 }
  0x23   :  { %p1888_p13 = por %p1887_p12, %p1886_p11 }
  0x25   :  { %p1889_p0 = pnand %p1888_p13, %p1882_p10 }
  0x27   :  { %1892 = shalt.err (!%p1889_p0)
}
  0x28   :  { %s2051_s22 = smov 64   ;;  %s2052_s23 = smov 4  }
  0x29   :  { %100 = dma.hbm_to_vmem [thread:$0]  %s2276_s8, 1024, %s95_s18, [#allocation12], %s2051_s22, %s2051_s22, %s2052_s23  }
  0x2a   :  { %s1901_s25 = scalar_lea.vmem %s123_s20, 1024  ;;  %p1906_p2 = scmp.lt.s32.totalorder %s123_s20, %s123_s20 }
  0x2b   :  { %p1902_p1 = scmp.ne.s32.totalorder %s123_s20, %s1901_s25  ;;  %p1907_p3 = scmp.lt.s32.totalorder %s1901_s25, %s1901_s25 }
  0x2d   :  { %p1908_p4 = por %p1907_p3, %p1906_p2 }
  0x2f   :  { %p1909_p5 = pnand %p1908_p4, %p1902_p1 }
  0x31   :  { %1912 = shalt.err (!%p1909_p5)
}
  0x32   :  { %128 = dma.hbm_to_vmem [thread:$0]  %s2280_s12, 1024, %s123_s20, [#allocation15], %s2051_s22, %s2051_s22, %s2052_s23  }
  0x33   :  { %s2053_s28 = smov [#allocation2]   ;;  %s2054_s17 = smov [#allocation7]  }
  0x34   :  { %s33_s0 = sshll.u32 %s2053_s28, 4  ;;  %s52_s1 = sshll.u32 %s2054_s17, 4  ;;  %s34_s0 = int_to_ptr.vmem [resolvable:$true] %s33_s0  ;;  %s53_s1 = int_to_ptr.vmem [resolvable:$true] %s52_s1 }
  0x35   :  { %s1921_s8 = scalar_lea.vmem %s34_s0, 128  ;;  %p1926_p7 = scmp.lt.s32.totalorder %s34_s0, %s34_s0 }
  0x36   :  { %p1922_p6 = scmp.ne.s32.totalorder %s34_s0, %s1921_s8  ;;  %p1927_p8 = scmp.lt.s32.totalorder %s1921_s8, %s1921_s8 }
  0x38   :  { %p1928_p9 = por %p1927_p8, %p1926_p7 }
  0x3a   :  { %p1929_p10 = pnand %p1928_p9, %p1922_p6 }
  0x3c   :  { %1932 = shalt.err (!%p1929_p10)
}
  0x3d   :  { %s2286_s21 = sld [smem:[#allocation24_spill]]  ;;  %s1941_s24 = scalar_lea.vmem %s53_s1, 4096 }
  0x3e   :  { %p1942_p11 = scmp.ne.s32.totalorder %s53_s1, %s1941_s24  ;;  %p1946_p12 = scmp.lt.s32.totalorder %s53_s1, %s53_s1 }
  0x3f   :  { %p1947_p13 = scmp.lt.s32.totalorder %s1941_s24, %s1941_s24 }
  0x41   :  { %p1948_p0 = por %p1947_p13, %p1946_p12 }
  0x43   :  { %36 = dma.hbm_to_vmem [thread:$0]  %s2286_s21, 128, %s34_s0, [#allocation3]  }
  0x44   :  { %p1949_p1 = pnand %p1948_p0, %p1942_p11 }
  0x46   :  { %1952 = shalt.err (!%p1949_p1)
}
  0x47   :  { %58 = dma.hbm_to_vmem [thread:$0]  %s2270_s2, 4096, %s53_s1, [#allocation6], %s2047_s29, %s2047_s29, %s2048_s30  }
  0x48   :  { %s2055_s4 = smov [#allocation10]   ;;  %s2056_s26 = smov [#allocation13]  }
  0x49   :  { %s80_s25 = sshll.u32 %s2055_s4, 4  ;;  %s108_s27 = sshll.u32 %s2056_s26, 4  ;;  %s81_s25 = int_to_ptr.vmem [resolvable:$true] %s80_s25  ;;  %s109_s27 = int_to_ptr.vmem [resolvable:$true] %s108_s27 }
  0x4a   :  { %s1961_s28 = scalar_lea.vmem %s81_s25, 1024  ;;  %p1966_p3 = scmp.lt.s32.totalorder %s81_s25, %s81_s25 }
  0x4b   :  { %p1962_p2 = scmp.ne.s32.totalorder %s81_s25, %s1961_s28  ;;  %p1967_p4 = scmp.lt.s32.totalorder %s1961_s28, %s1961_s28 }
  0x4d   :  { %p1968_p5 = por %p1967_p4, %p1966_p3 }
  0x4f   :  { %p1969_p6 = pnand %p1968_p5, %p1962_p2 }
  0x51   :  { %1972 = shalt.err (!%p1969_p6)
}
  0x52   :  { %86 = dma.hbm_to_vmem [thread:$0]  %s2274_s6, 1024, %s81_s25, [#allocation9], %s2051_s22, %s2051_s22, %s2052_s23  }
  0x53   :  { %s1981_s2 = scalar_lea.vmem %s109_s27, 1024  ;;  %p1986_p8 = scmp.lt.s32.totalorder %s109_s27, %s109_s27 }
  0x54   :  { %p1982_p7 = scmp.ne.s32.totalorder %s109_s27, %s1981_s2  ;;  %p1987_p9 = scmp.lt.s32.totalorder %s1981_s2, %s1981_s2 }
  0x56   :  { %p1988_p10 = por %p1987_p9, %p1986_p8 }
  0x58   :  { %p1989_p11 = pnand %p1988_p10, %p1982_p7 }
  0x5a   :  { %1992 = shalt.err (!%p1989_p11)
}
  0x5b   :  { %114 = dma.hbm_to_vmem [thread:$0]  %s2278_s10, 1024, %s109_s27, [#allocation12], %s2051_s22, %s2051_s22, %s2052_s23  }
  0x5c   :  { %s2057_s1 = smov [#allocation16]  }
  0x5d   :  { %s136_s8 = sshll.u32 %s2057_s1, 4  ;;  %s137_s8 = int_to_ptr.vmem [resolvable:$true] %s136_s8 }
  0x5e   :  { %s2001_s18 = scalar_lea.vmem %s137_s8, 4096  ;;  %p2006_p13 = scmp.lt.s32.totalorder %s137_s8, %s137_s8 }
  0x5f   :  { %p2002_p12 = scmp.ne.s32.totalorder %s137_s8, %s2001_s18  ;;  %p2007_p0 = scmp.lt.s32.totalorder %s2001_s18, %s2001_s18 }
  0x61   :  { %p2008_p1 = por %p2007_p0, %p2006_p13 }
  0x63   :  { %p2009_p2 = pnand %p2008_p1, %p2002_p12 }
  0x65   :  { %2012 = shalt.err (!%p2009_p2)
}
  0x66   :  { %142 = dma.hbm_to_vmem [thread:$0]  %s2282_s14, 4096, %s137_s8, [#allocation15], %s2051_s22, %s2051_s22, %s2052_s23  }
  0x67   :  { %2033 = dma.done.wait [#allocation3], 128  }
  0x68   :  { %2034 = vsyncadd [#allocation3], 4294967168 }
  0x69   :  { %2035 = dma.done.wait [#allocation6], 4160  }
  0x6a   :  { %2036 = vsyncadd [#allocation6], 4294963136 }
  0x6b   :  { %2037 = dma.done.wait [#allocation9], 3072  }
  0x6c   :  { %2038 = vsyncadd [#allocation9], 4294964224 }
  0x6d   :  { %2039 = dma.done.wait [#allocation12], 2048  }
  0x6e   :  { %2040 = vsyncadd [#allocation12], 4294965248 }
  0x6f   :  { %2041 = dma.done.wait [#allocation15], 5120  }
  0x70   :  { %2042 = vsyncadd [#allocation15], 4294962176  ;;  %v2058_v0 = vmov 0   ;;  %v1695_v1 = vld [vmem:[#allocation7 + $0x74] ss:$8 sps:$4 sm:$0xff]   ;;  %v2059_v50 = vmov 0.0  }
  0x71   :  { %571 = vmatprep.mubr.bf16.mxu1 %v2058_v0  ;;  %v1697_v2 = vld [vmem:[#allocation7 + $0x70] ss:$8 sps:$4 sm:$0xff]   ;;  %386 = vmatprep.subr.bf16.mxu0 %v1695_v1  ;;  %v1698_v3 = vld [vmem:[#allocation7 + $0x64] ss:$8 sps:$4 sm:$0xff]   ;;  %v1700_v4 = vld [vmem:[#allocation7 + $0x60] ss:$8 sps:$4 sm:$0xff]  }
  0x72   :  { %387 = vmatpush1.bf16.msra.mxu0 %v1697_v2  ;;  %v1701_v5 = vld [vmem:[#allocation7 + $0x54] ss:$8 sps:$4 sm:$0xff]   ;;  %v1703_v6 = vld [vmem:[#allocation7 + $0x50] ss:$8 sps:$4 sm:$0xff]   ;;  %v1704_v7 = vld [vmem:[#allocation7 + $0x44] ss:$8 sps:$4 sm:$0xff]  }
  0x73   :  { %388 = vmatprep.subr.bf16.mxu0 %v1698_v3  ;;  %v1706_v8 = vld [vmem:[#allocation7 + $0x40] ss:$8 sps:$4 sm:$0xff]   ;;  %v1707_v9 = vld [vmem:[#allocation7 + $0x34] ss:$8 sps:$4 sm:$0xff]   ;;  %v1709_v10 = vld [vmem:[#allocation7 + $0x30] ss:$8 sps:$4 sm:$0xff]  }
  0x74   :  { %v1710_v11 = vld [vmem:[#allocation7 + $0x24] ss:$8 sps:$4 sm:$0xff]   ;;  %v1712_v12 = vld [vmem:[#allocation7 + $0x20] ss:$8 sps:$4 sm:$0xff]   ;;  %v1713_v13 = vld [vmem:[#allocation7 + $0x14] ss:$8 sps:$4 sm:$0xff]  }
  0x75   :  { %v1740_v14 = vld [vmem:[#allocation8 + $0x74] ss:$8 sps:$4 sm:$0xff]   ;;  %v1742_v15 = vld [vmem:[#allocation8 + $0x70] ss:$8 sps:$4 sm:$0xff]   ;;  %v1716_v17 = vld [vmem:[#allocation7 + $0x4] ss:$8 sps:$4 sm:$0xff]  }
  0x76   :  { %389 = vmatpush1.bf16.msra.mxu0 %v1700_v4  ;;  %v1715_v16 = vld [vmem:[#allocation7 + $0x10] ss:$8 sps:$4 sm:$0xff]   ;;  %539 = vmatprep.subr.bf16.mxu1 %v1740_v14  ;;  %v1746_v18 = vld [vmem:[#allocation8 + $0x64] ss:$8 sps:$4 sm:$0xff]   ;;  %v1748_v19 = vld [vmem:[#allocation8 + $0x60] ss:$8 sps:$4 sm:$0xff]  }
  0x77   :  { %390 = vmatprep.subr.bf16.mxu0 %v1701_v5  ;;  %540 = vmatpush1.bf16.msra.mxu1 %v1742_v15  ;;  %v2195_v20 = vld [vmem:[#allocation2] sm:$0xff]  ;;  %v1718_v23 = vld [vmem:[#allocation7] ss:$8 sps:$4 sm:$0xff]   ;;  %v1754_v26 = vld [vmem:[#allocation8 + $0x44] ss:$8 sps:$4 sm:$0xff]   ;;  %vm2060_vm0 = vmmov 0  }
  0x78   :  { %541 = vmatprep.subr.bf16.mxu1 %v1746_v18  ;;  %v1400_v21 = vcombine.high %v2195_v20, %v2195_v20  ;;  %v1751_v22 = vld [vmem:[#allocation8 + $0x54] ss:$8 sps:$4 sm:$0xff]   ;;  %v1753_v25 = vld [vmem:[#allocation8 + $0x50] ss:$8 sps:$4 sm:$0xff]   ;;  %v1756_v28 = vld [vmem:[#allocation8 + $0x40] ss:$8 sps:$4 sm:$0xff]   ;;  %v1399_v58 = vcombine.low %v2195_v20, %v2195_v20 }
  0x79   :  { %v1719_v24 = vld [vmem:[#allocation7 + $0xf4] ss:$8 sps:$4 sm:$0xff]   ;;  %v1721_v27 = vld [vmem:[#allocation7 + $0xf0] ss:$8 sps:$4 sm:$0xff]   ;;  %v1722_v29 = vld [vmem:[#allocation7 + $0xe4] ss:$8 sps:$4 sm:$0xff]  }
  0x7a   :  { %391 = vmatpush1.bf16.msra.mxu0 %v1703_v6  ;;  %418 = vmatprep.mubr.bf16.mxu0 %v1400_v21  ;;  %v1757_v30 = vld [vmem:[#allocation8 + $0x34] ss:$8 sps:$4 sm:$0xff]   ;;  %v1724_v31 = vld [vmem:[#allocation7 + $0xe0] ss:$8 sps:$4 sm:$0xff]   ;;  %v1759_v33 = vld [vmem:[#allocation8 + $0x30] ss:$8 sps:$4 sm:$0xff]   ;;  %v209_v6 = vlaneseq }
  0x7b   :  { %392 = vmatprep.subr.bf16.mxu0 %v1704_v7  ;;  %542 = vmatpush1.bf16.msra.mxu1 %v1748_v19  ;;  %v1725_v32 = vld [vmem:[#allocation7 + $0xd4] ss:$8 sps:$4 sm:$0xff]   ;;  %v1760_v34 = vld [vmem:[#allocation8 + $0x24] ss:$8 sps:$4 sm:$0xff]   ;;  %v1727_v35 = vld [vmem:[#allocation7 + $0xd0] ss:$8 sps:$4 sm:$0xff]  }
  0x7c   :  { %543 = vmatprep.subr.bf16.mxu1 %v1751_v22  ;;  %v1728_v36 = vld [vmem:[#allocation7 + $0xc4] ss:$8 sps:$4 sm:$0xff]   ;;  %v1762_v37 = vld [vmem:[#allocation8 + $0x20] ss:$8 sps:$4 sm:$0xff]   ;;  %v1763_v38 = vld [vmem:[#allocation8 + $0x14] ss:$8 sps:$4 sm:$0xff]  }
  0x7d   :  { %v1730_v39 = vld [vmem:[#allocation7 + $0xc0] ss:$8 sps:$4 sm:$0xff]   ;;  %v1731_v40 = vld [vmem:[#allocation7 + $0xb4] ss:$8 sps:$4 sm:$0xff]   ;;  %v1765_v41 = vld [vmem:[#allocation8 + $0x10] ss:$8 sps:$4 sm:$0xff]  }
  0x7e   :  { %393 = vmatpush1.bf16.msra.mxu0 %v1706_v8  ;;  %v1766_v42 = vld [vmem:[#allocation8 + $0x4] ss:$8 sps:$4 sm:$0xff]   ;;  %v1733_v43 = vld [vmem:[#allocation7 + $0xb0] ss:$8 sps:$4 sm:$0xff]   ;;  %v1768_v44 = vld [vmem:[#allocation8] ss:$8 sps:$4 sm:$0xff]  }
  0x7f   :  { %394 = vmatprep.subr.bf16.mxu0 %v1707_v9  ;;  %544 = vmatpush1.bf16.msra.mxu1 %v1753_v25  ;;  %v1734_v45 = vld [vmem:[#allocation7 + $0xa4] ss:$8 sps:$4 sm:$0xff]   ;;  %v1736_v46 = vld [vmem:[#allocation7 + $0xa0] ss:$8 sps:$4 sm:$0xff]   ;;  %v174_v47 = vld [vmem:[#allocation5] sm:$0xf] }
  0x80   :  { %545 = vmatprep.subr.bf16.mxu1 %v1754_v26  ;;  %v1769_v48 = vld [vmem:[#allocation10 + $0x38] sm:$0xff]   ;;  %v1771_v52 = vld [vmem:[#allocation10 + $0x30] sm:$0xff]   ;;  %v1743_v53 = vld [vmem:[#allocation7 + $0x84] ss:$8 sps:$4 sm:$0xff]   ;;  %v210_v8 = vshrl.u32 %v209_v6, 7  ;;  %s2061_s4 = smov [#allocation17]  }
  0x81   :  { %v1737_v49 = vld [vmem:[#allocation7 + $0x94] ss:$8 sps:$4 sm:$0xff]   ;;  %v1739_v51 = vld [vmem:[#allocation7 + $0x90] ss:$8 sps:$4 sm:$0xff]   ;;  %v1745_v54 = vld [vmem:[#allocation7 + $0x80] ss:$8 sps:$4 sm:$0xff]  }
  0x82   :  { %395 = vmatpush1.bf16.msra.mxu0 %v1709_v10  ;;  %v1773_v55 = vld [vmem:[#allocation10 + $0x28] sm:$0xff]   ;;  %v1770_v56 = vld [vmem:[#allocation11 + $0x38] sm:$0xff]   ;;  %v1775_v57 = vld [vmem:[#allocation10 + $0x20] sm:$0xff]   ;;  %v215_v14 = vsub.s32 1, %v210_v8  ;;  %s1386_s25 = sshll.u32 %s2061_s4, 4  ;;  %s1387_s25 = int_to_ptr.vmem [resolvable:$true] %s1386_s25 }
  0x83   :  { %396 = vmatprep.subr.bf16.mxu0 %v1710_v11  ;;  %546 = vmatpush1.bf16.msra.mxu1 %v1756_v28  ;;  %v1772_v59 = vld [vmem:[#allocation11 + $0x30] sm:$0xff]   ;;  %v1777_v60 = vld [vmem:[#allocation10 + $0x18] sm:$0xff]   ;;  %v1774_v61 = vld [vmem:[#allocation11 + $0x28] sm:$0xff]   ;;  %v211_v11 = vsub.s32 0, %v210_v8  ;;  %s2013_s26 = scalar_lea.vmem %s1387_s25, 128  ;;  %p2018_p4 = scmp.lt.s32.totalorder %s1387_s25, %s1387_s25 }
  0x84   :  { %547 = vmatprep.subr.bf16.mxu1 %v1757_v30  ;;  %v1779_v62 = vld [vmem:[#allocation10 + $0x10] sm:$0xff]   ;;  %v1776_v63 = vld [vmem:[#allocation11 + $0x20] sm:$0xff]   ;;  %v1781_v0 = vld [vmem:[#allocation10 + $0x8] sm:$0xff]   ;;  %p2014_p3 = scmp.ne.s32.totalorder %s1387_s25, %s2013_s26  ;;  %p2019_p5 = scmp.lt.s32.totalorder %s2013_s26, %s2013_s26 }
  0x85   :  { %v1778_v1 = vld [vmem:[#allocation11 + $0x18] sm:$0xff]   ;;  %v1780_v2 = vld [vmem:[#allocation11 + $0x10] sm:$0xff]   ;;  %v1782_v3 = vld [vmem:[#allocation11 + $0x8] sm:$0xff]  }
  0x86   :  { %397 = vmatpush1.bf16.msra.mxu0 %v1712_v12  ;;  %v1783_v4 = vld [vmem:[#allocation10] sm:$0xff]   ;;  %v207_v12 = vld [vmem:[%s2271_s3] sm:$0x3]  ;;  %v1821_v8 = vld [vmem:[#allocation16 + $0xe8] sm:$0xff]   ;;  %p2020_p6 = por %p2019_p5, %p2018_p4 }
  0x87   :  { %398 = vmatprep.subr.bf16.mxu0 %v1713_v13  ;;  %548 = vmatpush1.bf16.msra.mxu1 %v1759_v33  ;;  %v1784_v5 = vld [vmem:[#allocation11] sm:$0xff]   ;;  %v212_v15 = vrot.slane %v207_v12, %v211_v11  ;;  %v1788_v30 = vld [vmem:[#allocation14 + $0x30] sm:$0xff]  }
  0x88   :  { %549 = vmatprep.subr.bf16.mxu1 %v1760_v34  ;;  %v1791_v33 = vld [vmem:[#allocation13 + $0x20] sm:$0xff]   ;;  %v1819_v6 = vld [vmem:[#allocation16 + $0xf0] sm:$0xff]   ;;  %p2021_p7 = pnand %p2020_p6, %p2014_p3 }
  0x89   :  { %v1792_v34 = vld [vmem:[#allocation14 + $0x20] sm:$0xff]  }
  0x8a   :  { %399 = vmatpush1.bf16.msra.mxu0 %v1715_v16  ;;  %v216_v16 = vrot.slane %v207_v12, %v215_v14  ;;  %v1825_v12 = vld [vmem:[#allocation16 + $0xd8] sm:$0xff]  }
  0x8b   :  { %400 = vmatprep.subr.bf16.mxu0 %v1716_v17  ;;  %550 = vmatpush1.bf16.msra.mxu1 %v1762_v37  ;;  %v1794_v37 = vld [vmem:[#allocation14 + $0x18] sm:$0xff]  }
  0x8c   :  { %551 = vmatprep.subr.bf16.mxu1 %v1763_v38 }
  0x8e   :  { %401 = vmatpush1.bf16.msra.mxu0 %v1718_v23  ;;  %v1785_v23 = vld [vmem:[#allocation13 + $0x38] sm:$0xff]  }
  0x8f   :  { %402 = vmatprep.subr.bf16.mxu0 %v1719_v24  ;;  %552 = vmatpush1.bf16.msra.mxu1 %v1765_v41 }
  0x90   :  { %553 = vmatprep.subr.bf16.mxu1 %v1766_v42 }
  0x92   :  { %403 = vmatpush2.bf16.msra.mxu0 %v1721_v27  ;;  %v1786_v27 = vld [vmem:[#allocation14 + $0x38] sm:$0xff]  }
  0x93   :  { %404 = vmatprep.subr.bf16.mxu0 %v1722_v29  ;;  %554 = vmatpush1.bf16.msra.mxu1 %v1768_v44  ;;  %v1787_v29 = vld [vmem:[#allocation13 + $0x30] sm:$0xff]   ;;  %v1798_v44 = vld [vmem:[#allocation14 + $0x8] sm:$0xff]  }
  0x94   :  { %1598 = vmatprep.subr.bf16.mxu1 %v2059_v50 }
  0x96   :  { %405 = vmatpush2.bf16.msra.mxu0 %v1724_v31  ;;  %572 = vmatmul.mubr.bf16.vlgmr.msra.gmra.mxu1 %v174_v47  ;;  %v1789_v31 = vld [vmem:[#allocation13 + $0x28] sm:$0xff]   ;;  %v1799_v47 = vld [vmem:[#allocation13] sm:$0xff]  }
  0x97   :  { %406 = vmatprep.subr.bf16.mxu0 %v1725_v32  ;;  %1599 = vmatpush3.bf16.msra.mxu1 %v1769_v48  ;;  %v1790_v32 = vld [vmem:[#allocation14 + $0x28] sm:$0xff]   ;;  %v1801_v48 = vld [vmem:[#allocation16 + $0x78] sm:$0xff]  }
  0x98   :  { %1600 = vmatprep.subr.bf16.mxu1 %v2059_v50  ;;  %1614 = vmatprep.mubr.msk.bf16.mxu1 %vm2060_vm0, %v2059_v50 }
  0x9a   :  { %407 = vmatpush2.bf16.msra.mxu0 %v1727_v35  ;;  %v1793_v35 = vld [vmem:[#allocation13 + $0x18] sm:$0xff]  }
  0x9b   :  { %408 = vmatprep.subr.bf16.mxu0 %v1728_v36  ;;  %1601 = vmatpush3.bf16.msra.mxu1 %v1771_v52  ;;  %v447_v36 = vld [vmem:[%s2273_s5] sm:$0x3] }
  0x9c   :  { %1602 = vmatprep.subr.bf16.mxu1 %v2059_v50  ;;  %v452_v38 = vrot.slane %v447_v36, %v211_v11  ;;  %v456_v42 = vrot.slane %v447_v36, %v215_v14  ;;  %v1824_v11 = vld [vmem:[#allocation16 + $0xa0] sm:$0xff]   ;;  %v1827_v14 = vld [vmem:[#allocation16 + $0xd0] sm:$0xff]  }
  0x9d   :  { %v1467_v36 = vld [vmem:[%s2279_s11] ss:$0 sm:$0xff] }
  0x9e   :  { %409 = vmatpush2.bf16.msra.mxu0 %v1730_v39  ;;  %v1795_v39 = vld [vmem:[#allocation13 + $0x10] sm:$0xff]  }
  0x9f   :  { %410 = vmatprep.subr.bf16.mxu0 %v1731_v40  ;;  %1603 = vmatpush3.bf16.msra.mxu1 %v1773_v55  ;;  %v1796_v40 = vld [vmem:[#allocation14 + $0x10] sm:$0xff]  }
  0xa0   :  { %1604 = vmatprep.subr.bf16.mxu1 %v2059_v50 }
  0xa2   :  { %411 = vmatpush2.bf16.msra.mxu0 %v1733_v43  ;;  %v1797_v43 = vld [vmem:[#allocation13 + $0x8] sm:$0xff]  }
  0xa3   :  { %412 = vmatprep.subr.bf16.mxu0 %v1734_v45  ;;  %1605 = vmatpush3.bf16.msra.mxu1 %v1775_v57  ;;  %v1805_v57 = vld [vmem:[#allocation16 + $0x68] sm:$0xff]  }
  0xa4   :  { %1606 = vmatprep.subr.bf16.mxu1 %v2059_v50 }
  0xa6   :  { %413 = vmatpush2.bf16.msra.mxu0 %v1736_v46 }
  0xa7   :  { %414 = vmatprep.subr.bf16.mxu0 %v1737_v49  ;;  %1607 = vmatpush3.bf16.msra.mxu1 %v1777_v60  ;;  %v1800_v49 = vld [vmem:[#allocation14] sm:$0xff]  }
  0xa8   :  { %1608 = vmatprep.subr.bf16.mxu1 %v2059_v50  ;;  %v1808_v60 = vld [vmem:[#allocation16 + $0x20] sm:$0xff]  }
  0xaa   :  { %415 = vmatpush2.bf16.msra.mxu0 %v1739_v51 }
  0xab   :  { %416 = vmatprep.subr.bf16.mxu0 %v1743_v53  ;;  %1609 = vmatpush3.bf16.msra.mxu1 %v1779_v62  ;;  %v1802_v53 = vld [vmem:[#allocation16 + $0x38] sm:$0xff]   ;;  %v1811_v62 = vld [vmem:[#allocation16 + $0x50] sm:$0xff]  }
  0xac   :  { %1610 = vmatprep.subr.bf16.mxu1 %v2059_v50 }
  0xae   :  { %417 = vmatpush2.bf16.msra.mxu0 %v1745_v54  ;;  %v1803_v54 = vld [vmem:[#allocation16 + $0x70] sm:$0xff]  }
  0xaf   :  { %1618 = vmatprep.subr.bf16.mxu0 %v2059_v50  ;;  %1611 = vmatpush3.bf16.msra.mxu1 %v1781_v0  ;;  %v1813_v0 = vld [vmem:[#allocation16 + $0x48] sm:$0xff]  }
  0xb0   :  { %1612 = vmatprep.subr.bf16.mxu1 %v2059_v50 }
  0xb1   :  { %419 = vmatmul.mubr.bf16.vlgmr.msra.gmra.mxu0 %v1399_v58  ;;  %v1806_v58 = vld [vmem:[#allocation16 + $0x28] sm:$0xff]  }
  0xb2   :  { %1619 = vmatpush3.bf16.msra.mxu0 %v1770_v56  ;;  %1634 = vmatprep.mubr.msk.bf16.mxu0 %vm2060_vm0, %v2059_v50  ;;  %v1804_v56 = vld [vmem:[#allocation16 + $0x30] sm:$0xff]  }
  0xb3   :  { %1620 = vmatprep.subr.bf16.mxu0 %v2059_v50  ;;  %1613 = vmatpush3.bf16.msra.mxu1 %v1783_v4  ;;  %v1817_v4 = vld [vmem:[#allocation16 + $0xf8] sm:$0xff]  }
  0xb4   :  { %1638 = vmatprep.subr.bf16.mxu1 %v2059_v50 }
  0xb6   :  { %1621 = vmatpush3.bf16.msra.mxu0 %v1772_v59  ;;  %v1807_v59 = vld [vmem:[#allocation16 + $0x60] sm:$0xff]  }
  0xb7   :  { %1622 = vmatprep.subr.bf16.mxu0 %v2059_v50 }
  0xba   :  { %1623 = vmatpush3.bf16.msra.mxu0 %v1774_v61  ;;  %v1810_v61 = vld [vmem:[#allocation16 + $0x18] sm:$0xff]  }
  0xbb   :  { %1624 = vmatprep.subr.bf16.mxu0 %v2059_v50 }
  0xbe   :  { %1625 = vmatpush3.bf16.msra.mxu0 %v1776_v63  ;;  %v1812_v63 = vld [vmem:[#allocation16 + $0x10] sm:$0xff]  }
  0xbf   :  { %1626 = vmatprep.subr.bf16.mxu0 %v2059_v50 }
  0xc2   :  { %1627 = vmatpush3.bf16.msra.mxu0 %v1778_v1  ;;  %v1814_v1 = vld [vmem:[#allocation16 + $0x8] sm:$0xff]  }
  0xc3   :  { %1628 = vmatprep.subr.bf16.mxu0 %v2059_v50 }
  0xc6   :  { %1629 = vmatpush3.bf16.msra.mxu0 %v1780_v2  ;;  %v1815_v2 = vld [vmem:[#allocation16 + $0x40] sm:$0xff]  }
  0xc7   :  { %1630 = vmatprep.subr.bf16.mxu0 %v2059_v50 }
  0xca   :  { %1631 = vmatpush3.bf16.msra.mxu0 %v1782_v3  ;;  %v1816_v3 = vld [vmem:[#allocation16] sm:$0xff]  }
  0xcb   :  { %1632 = vmatprep.subr.bf16.mxu0 %v2059_v50 }
  0xce   :  { %1633 = vmatpush3.bf16.msra.mxu0 %v1784_v5  ;;  %v1818_v5 = vld [vmem:[#allocation16 + $0xb8] sm:$0xff]  }
  0xcf   :  { %1658 = vmatprep.subr.bf16.mxu0 %v2059_v50 }
 0x156   :  { %v573_v7 = vpop.f32.mrf.mxu1 }
 0x157   :  { %v574_v41 = vadd.f32 %v573_v7, %v452_v38  ;;  %v1820_v7 = vld [vmem:[#allocation16 + $0xb0] sm:$0xff]  }
 0x158   :  { %v2223_v9 = vpop.f32.mrf.mxu1  ;;  %v1476_v38 = vld [vmem:[%s2281_s13] ss:$0 sm:$0xff] }
 0x159   :  { %v580_v45 = vmax.f32 %v574_v41, 0.0  ;;  %v576_v46 = vadd.f32 %v2223_v9, %v456_v42  ;;  %v1822_v9 = vld [vmem:[#allocation16 + $0xa8] sm:$0xff]  }
 0x15a   :  { %v577_v10 = vpop.f32.mrf.mxu1 }
 0x15b   :  { %v582_v51 = vpack.c.bf16 %v580_v45, %v580_v45  ;;  %v581_v52 = vmax.f32 %v576_v46, 0.0  ;;  %v1823_v10 = vld [vmem:[#allocation16 + $0xe0] sm:$0xff]  }
 0x15c   :  { %v578_v13 = vpop.f32.mrf.mxu1 }
 0x15d   :  { %v583_v55 = vpack.c.bf16 %v581_v52, %v581_v52  ;;  %v1826_v13 = vld [vmem:[#allocation16 + $0x98] sm:$0xff]  }
 0x171   :  { %v420_v17 = vpop.f32.mrf.mxu0 }
 0x172   :  { %v421_v18 = vadd.f32 %v420_v17, %v212_v15  ;;  %v1828_v15 = vld [vmem:[#allocation16 + $0x90] sm:$0xff]   ;;  %v1830_v17 = vld [vmem:[#allocation16 + $0x88] sm:$0xff]  }
 0x173   :  { %v422_v19 = vpop.f32.mrf.mxu0 }
 0x174   :  { %v427_v20 = vmax.f32 %v421_v18, 0.0  ;;  %v423_v21 = vadd.f32 %v422_v19, %v216_v16  ;;  %v1829_v16 = vld [vmem:[#allocation16 + $0xc8] sm:$0xff]   ;;  %v1831_v18 = vld [vmem:[#allocation16 + $0xc0] sm:$0xff]  }
 0x175   :  { %v424_v22 = vpop.f32.mrf.mxu0  ;;  %v1832_v19 = vld [vmem:[#allocation16 + $0x80] sm:$0xff]  }
 0x176   :  { %v429_v24 = vpack.c.bf16 %v427_v20, %v427_v20  ;;  %v428_v25 = vmax.f32 %v423_v21, 0.0  ;;  %v1449_v20 = vld [vmem:[%s2275_s7] ss:$0 sm:$0xff] }
 0x177   :  { %v425_v26 = vpop.f32.mrf.mxu0  ;;  %v1458_v22 = vld [vmem:[%s2277_s9] ss:$0 sm:$0xff] }
 0x178   :  { %v430_v28 = vpack.c.bf16 %v428_v25, %v428_v25  ;;  %1615 = vmatmul.mubr.bf16.vlgmr.msra.gmra.mxu1 %v429_v24 }
 0x179   :  { %1639 = vmatpush3.bf16.msra.mxu1 %v1785_v23  ;;  %1654 = vmatprep.mubr.msk.bf16.mxu1 %vm2060_vm0, %v2059_v50 }
 0x17a   :  { %1635 = vmatmul.mubr.bf16.vlgmr.msra.gmra.mxu0 %v430_v28  ;;  %1640 = vmatprep.subr.bf16.mxu1 %v2059_v50 }
 0x17b   :  { %1659 = vmatpush3.bf16.msra.mxu0 %v1786_v27  ;;  %1674 = vmatprep.mubr.msk.bf16.mxu0 %vm2060_vm0, %v2059_v50 }
 0x17c   :  { %1660 = vmatprep.subr.bf16.mxu0 %v2059_v50 }
 0x17d   :  { %1641 = vmatpush3.bf16.msra.mxu1 %v1787_v29 }
 0x17e   :  { %1642 = vmatprep.subr.bf16.mxu1 %v2059_v50 }
 0x17f   :  { %1661 = vmatpush3.bf16.msra.mxu0 %v1788_v30 }
 0x180   :  { %1662 = vmatprep.subr.bf16.mxu0 %v2059_v50 }
 0x181   :  { %1643 = vmatpush3.bf16.msra.mxu1 %v1789_v31 }
 0x182   :  { %1644 = vmatprep.subr.bf16.mxu1 %v2059_v50 }
 0x183   :  { %1663 = vmatpush3.bf16.msra.mxu0 %v1790_v32 }
 0x184   :  { %1664 = vmatprep.subr.bf16.mxu0 %v2059_v50 }
 0x185   :  { %1645 = vmatpush3.bf16.msra.mxu1 %v1791_v33 }
 0x186   :  { %1646 = vmatprep.subr.bf16.mxu1 %v2059_v50 }
 0x187   :  { %1665 = vmatpush3.bf16.msra.mxu0 %v1792_v34 }
 0x188   :  { %1666 = vmatprep.subr.bf16.mxu0 %v2059_v50 }
 0x189   :  { %1647 = vmatpush3.bf16.msra.mxu1 %v1793_v35 }
 0x18a   :  { %1648 = vmatprep.subr.bf16.mxu1 %v2059_v50 }
 0x18b   :  { %1667 = vmatpush3.bf16.msra.mxu0 %v1794_v37 }
 0x18c   :  { %1668 = vmatprep.subr.bf16.mxu0 %v2059_v50 }
 0x18d   :  { %1649 = vmatpush3.bf16.msra.mxu1 %v1795_v39 }
 0x18e   :  { %1650 = vmatprep.subr.bf16.mxu1 %v2059_v50 }
 0x18f   :  { %1669 = vmatpush3.bf16.msra.mxu0 %v1796_v40 }
 0x190   :  { %1670 = vmatprep.subr.bf16.mxu0 %v2059_v50 }
 0x191   :  { %1651 = vmatpush3.bf16.msra.mxu1 %v1797_v43 }
 0x192   :  { %1652 = vmatprep.subr.bf16.mxu1 %v2059_v50 }
 0x193   :  { %1671 = vmatpush3.bf16.msra.mxu0 %v1798_v44 }
 0x194   :  { %1672 = vmatprep.subr.bf16.mxu0 %v2059_v50  ;;  %v1809_v50 = vld [vmem:[#allocation16 + $0x58] sm:$0xff]  }
 0x195   :  { %1653 = vmatpush3.bf16.msra.mxu1 %v1799_v47 }
 0x196   :  { %1554 = vmatprep.subr.bf16.mxu1 %v1801_v48 }
 0x197   :  { %1673 = vmatpush3.bf16.msra.mxu0 %v1800_v49 }
 0x198   :  { %1655 = vmatmul.mubr.bf16.vlgmr.msra.gmra.mxu1 %v582_v51  ;;  %1576 = vmatprep.subr.bf16.mxu0 %v1817_v4 }
 0x199   :  { %1555 = vmatpush3.bf16.msra.mxu1 %v1802_v53 }
 0x19a   :  { %1675 = vmatmul.mubr.bf16.vlgmr.msra.gmra.mxu0 %v583_v55  ;;  %1556 = vmatprep.subr.bf16.mxu1 %v1803_v54 }
 0x19b   :  { %1577 = vmatpush3.bf16.msra.mxu0 %v1818_v5 }
 0x19c   :  { %1578 = vmatprep.subr.bf16.mxu0 %v1819_v6 }
 0x19d   :  { %1557 = vmatpush3.bf16.msra.mxu1 %v1804_v56 }
 0x19e   :  { %1558 = vmatprep.subr.bf16.mxu1 %v1805_v57 }
 0x19f   :  { %1579 = vmatpush3.bf16.msra.mxu0 %v1820_v7 }
 0x1a0   :  { %1580 = vmatprep.subr.bf16.mxu0 %v1821_v8 }
 0x1a1   :  { %1559 = vmatpush3.bf16.msra.mxu1 %v1806_v58  ;;  %v1485_v58 = vld [vmem:[%s2283_s15] ss:$0 sm:$0xff] }
 0x1a2   :  { %1560 = vmatprep.subr.bf16.mxu1 %v1807_v59 }
 0x1a3   :  { %1581 = vmatpush3.bf16.msra.mxu0 %v1822_v9 }
 0x1a4   :  { %1582 = vmatprep.subr.bf16.mxu0 %v1823_v10 }
 0x1a5   :  { %1561 = vmatpush3.bf16.msra.mxu1 %v1808_v60 }
 0x1a6   :  { %1562 = vmatprep.subr.bf16.mxu1 %v1809_v50 }
 0x1a7   :  { %1583 = vmatpush3.bf16.msra.mxu0 %v1824_v11 }
 0x1a8   :  { %1584 = vmatprep.subr.bf16.mxu0 %v1825_v12 }
 0x1a9   :  { %1563 = vmatpush3.bf16.msra.mxu1 %v1810_v61 }
 0x1aa   :  { %1564 = vmatprep.subr.bf16.mxu1 %v1811_v62 }
 0x1ab   :  { %1585 = vmatpush3.bf16.msra.mxu0 %v1826_v13 }
 0x1ac   :  { %1586 = vmatprep.subr.bf16.mxu0 %v1827_v14 }
 0x1ad   :  { %1565 = vmatpush3.bf16.msra.mxu1 %v1812_v63 }
 0x1ae   :  { %1566 = vmatprep.subr.bf16.mxu1 %v1813_v0 }
 0x1af   :  { %1587 = vmatpush3.bf16.msra.mxu0 %v1828_v15 }
 0x1b0   :  { %1588 = vmatprep.subr.bf16.mxu0 %v1829_v16 }
 0x1b1   :  { %1567 = vmatpush3.bf16.msra.mxu1 %v1814_v1 }
 0x1b2   :  { %1568 = vmatprep.subr.bf16.mxu1 %v1815_v2 }
 0x1b3   :  { %1589 = vmatpush3.bf16.msra.mxu0 %v1830_v17 }
 0x1b4   :  { %1590 = vmatprep.subr.bf16.mxu0 %v1831_v18 }
 0x1b5   :  { %1569 = vmatpush3.bf16.msra.mxu1 %v1816_v3 }
 0x1b7   :  { %1591 = vmatpush3.bf16.msra.mxu0 %v1832_v19 }
 0x238   :  { %v689_v21 = vpop.f32.mrf.mxu1 }
 0x239   :  { %v690_v23 = vadd.f32 %v1449_v20, %v689_v21 }
 0x23a   :  { %v1616_v24 = vpop.f32.mrf.mxu1  ;;  %v802_v25 = vpop.f32.mrf.mxu0 }
 0x23b   :  { %v803_v26 = vadd.f32 %v1458_v22, %v802_v25  ;;  %v695_v27 = vmax.f32 %v690_v23, 0.0 }
 0x23c   :  { %v692_v28 = vpop.f32.mrf.mxu1  ;;  %v1636_v29 = vpop.f32.mrf.mxu0 }
 0x23d   :  { %v808_v30 = vmax.f32 %v803_v26, 0.0  ;;  %v696_v34 = vpack.c.bf16 %v695_v27, %v695_v27 }
 0x23e   :  { %v1617_v31 = vpop.f32.mrf.mxu1  ;;  %v805_v32 = vpop.f32.mrf.mxu0 }
 0x23f   :  { %v809_v33 = vpack.c.bf16 %v808_v30, %v808_v30 }
 0x240   :  { %v1637_v35 = vpop.f32.mrf.mxu0 }
 0x241   :  { %1331 = vmatprep.mubr.bf16.mxu1 %v809_v33 }
 0x242   :  { %1332 = vmatmul.mubr.bf16.vlgmr.msra.gmra.mxu1 %v696_v34 }
 0x258   :  { %v915_v37 = vpop.f32.mrf.mxu1 }
 0x259   :  { %v916_v39 = vadd.f32 %v1467_v36, %v915_v37 }
 0x25a   :  { %v1656_v40 = vpop.f32.mrf.mxu1  ;;  %v1028_v41 = vpop.f32.mrf.mxu0 }
 0x25b   :  { %v1029_v42 = vadd.f32 %v1476_v38, %v1028_v41  ;;  %v921_v43 = vmax.f32 %v916_v39, 0.0 }
 0x25c   :  { %v918_v44 = vpop.f32.mrf.mxu1  ;;  %v1676_v45 = vpop.f32.mrf.mxu0 }
 0x25d   :  { %v1034_v46 = vmax.f32 %v1029_v42, 0.0  ;;  %v922_v51 = vpack.c.bf16 %v921_v43, %v921_v43 }
 0x25e   :  { %v1657_v47 = vpop.f32.mrf.mxu1  ;;  %v1031_v48 = vpop.f32.mrf.mxu0 }
 0x25f   :  { %v1035_v49 = vpack.c.bf16 %v1034_v46, %v1034_v46 }
 0x260   :  { %v1677_v52 = vpop.f32.mrf.mxu0 }
 0x261   :  { %1371 = vmatprep.mubr.bf16.mxu0 %v1035_v49 }
 0x262   :  { %1372 = vmatmul.mubr.bf16.vlgmr.msra.gmra.mxu0 %v922_v51 }
 0x302   :  { %v1570_v53 = vpop.f32.mrf.mxu1 }
 0x304   :  { %v1571_v54 = vpop.f32.mrf.mxu1 }
 0x305   :  { %v1572_v57 = vadd.f32 %v1571_v54, %v1570_v53 }
 0x306   :  { %v1573_v55 = vpop.f32.mrf.mxu1 }
 0x307   :  { %v1334_v50 = vadd.f32 %v1572_v57, %v1485_v58 }
 0x308   :  { %v1574_v56 = vpop.f32.mrf.mxu1 }
 0x322   :  { %v1592_v59 = vpop.f32.mrf.mxu0 }
 0x324   :  { %v1593_v60 = vpop.f32.mrf.mxu0 }
 0x325   :  { %v1594_v61 = vadd.f32 %v1593_v60, %v1592_v59 }
 0x326   :  { %v1595_v62 = vpop.f32.mrf.mxu0 }
 0x327   :  { %v1374_v63 = vadd.f32 %v1594_v61, %v1334_v50 }
 0x328   :  { %v1596_v0 = vpop.f32.mrf.mxu0 }
 0x329   :  { %1379 = vst [vmem:[#allocation17] sm:$0xff] %v1374_v63 }
 0x32a   :  { %2024 = shalt.err (!%p2021_p7)
}
 0x32b   :  { %1389 = dma.vmem_to_hbm [thread:$0]  %s1387_s25, 128, %s2284_s16, [#allocation4]  }
 0x32c   :  { %2043 = dma.done.wait [#allocation4], 128  }
 0x32d   :  { %2044 = vsyncadd [#allocation4], 4294967168 }
 0x32e   :  { %1393 = vsyncpa [#allocation3], 1 }
 0x32f   :  { %1394 = vsyncpa [#allocation6], 1 }
 0x330   :  { %1395 = vsyncpa [#allocation9], 1 }
 0x331   :  { %1396 = vsyncpa [#allocation12], 1 }
 0x332   :  { %1397 = vsyncpa [#allocation15], 1 }
 0x333   :  { %1398 = vsyncpa [#allocation4], 1 }

</bundles_post_ra>
